<compile_context>
chip_gen: v6e
topology: v6e:2x2x1
jax: 0.10.0
libtpu: 0.0.40
codegen_flags: <defaults>
</compile_context>

<pallas_src>
import functools

import jax
import jax.numpy as jnp
from jax.experimental import pallas as pl
from jax.experimental.pallas import tpu as pltpu


# ----------------------------------------------------------------------------
# Tiled linear kernel: y = x @ w.T + b   (w in PyTorch (Dout, Din) layout)
# ----------------------------------------------------------------------------
def _linear_kernel(x_ref, w_ref, b_ref, o_ref, acc_ref):
    @pl.when(pl.program_id(2) == 0)
    def _init():
        acc_ref[...] = jnp.zeros_like(acc_ref)

    acc_ref[...] += jax.lax.dot_general(
        x_ref[...], w_ref[...],
        dimension_numbers=(((1,), (1,)), ((), ())),   # contract Din of both
        preferred_element_type=jnp.float32)

    @pl.when(pl.program_id(2) == pl.num_programs(2) - 1)
    def _done():
        o_ref[...] = (acc_ref[...] + b_ref[...]).astype(o_ref.dtype)


def _pick_tile(dim, cap, align):
    """Largest aligned tile <= cap that divides dim, else the full dim."""
    if dim <= cap:
        return dim
    t = (cap // align) * align
    while t >= align:
        if dim % t == 0:
            return t
        t -= align
    return dim


def linear_pallas(x2d, w, b, *, tm_cap=256, tn_cap=256, tk_cap=512):
    M, Din = x2d.shape
    Dout = w.shape[0]
    tm = _pick_tile(M, tm_cap, 8)
    tn = _pick_tile(Dout, tn_cap, 128)
    tk = _pick_tile(Din, tk_cap, 128)
    b2d = b.reshape(1, Dout)
    grid = (M // tm, Dout // tn, Din // tk)
    return pl.pallas_call(
        _linear_kernel,
        out_shape=jax.ShapeDtypeStruct((M, Dout), x2d.dtype),
        grid=grid,
        in_specs=[
            pl.BlockSpec((tm, tk), lambda i, j, kk: (i, kk)),
            pl.BlockSpec((tn, tk), lambda i, j, kk: (j, kk)),
            pl.BlockSpec((1, tn), lambda i, j, kk: (0, j)),
        ],
        out_specs=pl.BlockSpec((tm, tn), lambda i, j, kk: (i, j)),
        scratch_shapes=[pltpu.VMEM((tm, tn), jnp.float32)],
        compiler_params=pltpu.CompilerParams(
            dimension_semantics=("parallel", "parallel", "arbitrary")),
    )(x2d, w, b2d)


# ----------------------------------------------------------------------------
# Attention kernel: one batch element per grid step, all heads inside.
# ----------------------------------------------------------------------------
def _attn_kernel(qkv_ref, rh_ref, rw_ref, e_ref, o_ref, *,
                 H, W, num_heads, head_dim, scale):
    N = H * W
    C = num_heads * head_dim

    Rh = rh_ref[...]                       # (H, Kh, hd)
    Rw = rw_ref[...]                       # (W, Kw, hd)
    E = e_ref[...].astype(jnp.float32)     # (Kh+Kw, N) stacked one-hots
    qkv = qkv_ref[0]                       # (N, 3C) q/k/v for every head

    head_outs = []
    for h in range(num_heads):
        q = qkv[:, h * head_dim:(h + 1) * head_dim]               # (N, hd)
        k = qkv[:, C + h * head_dim:C + (h + 1) * head_dim]       # (N, hd)
        v = qkv[:, 2 * C + h * head_dim:2 * C + (h + 1) * head_dim]

        # scores = (q * scale) @ k^T   (contract last dims, no transpose)
        attn = jax.lax.dot_general(
            q * scale, k, (((1,), (1,)), ((), ())),
            preferred_element_type=jnp.float32)                   # (N, N)

        # decomposed rel-pos bias (uses un-scaled q, as in the reference)
        q3 = q.reshape(H, W, head_dim)                            # (H, W, hd)
        # rel_h[h', w, kh] = sum_c q3[h', w, c] * Rh[h', kh, c]  -> MXU batched
        rel_h = jax.lax.dot_general(
            q3, Rh, (((2,), (2,)), ((0,), (0,))),
            preferred_element_type=jnp.float32)                   # (H, W, Kh)
        # rel_w[h', w, kw] = sum_c q3[h', w, c] * Rw[w, kw, c]  (small VPU op)
        rel_w = jnp.sum(q3[:, :, None, :] * Rw[None, :, :, :],
                        axis=-1).astype(jnp.float32)              # (H, W, Kw)

        # bias[n, m] = rel_h[n, m // W] + rel_w[n, m % W]; expand with one
        # MXU matmul against the stacked one-hot matrix built in the wrapper.
        rel = jnp.concatenate(
            [rel_h.reshape(N, -1), rel_w.reshape(N, -1)], axis=-1)  # (N, Kh+Kw)
        attn = attn + jnp.dot(rel, E, preferred_element_type=jnp.float32)

        # softmax, normalizing AFTER the PV matmul (EUP reciprocal)
        attn = attn - jnp.max(attn, axis=-1, keepdims=True)
        p = jnp.exp(attn)
        denom = jnp.sum(p, axis=-1, keepdims=True)                # (N, 1)
        o = jnp.dot(p, v, preferred_element_type=jnp.float32)     # (N, hd)
        head_outs.append(o * pl.reciprocal(denom, approx=True))

    # single head-concatenated, lane-dense output store (N, C)
    o_ref[0] = jnp.concatenate(head_outs, axis=-1).astype(o_ref.dtype)


def attention_pallas(qkv, Rh, Rw, E, *, num_heads, H, W, scale):
    B, N, threeC = qkv.shape
    C = threeC // 3
    hd = C // num_heads
    Kh, Kw = Rh.shape[1], Rw.shape[1]
    kernel = functools.partial(_attn_kernel, H=H, W=W, num_heads=num_heads,
                               head_dim=hd, scale=scale)
    # TODO(synk): for SAM global attention (large N) the full (N, N) scores
    # exceed VMEM (esp. v7x 64 MiB); that path needs KV-axis tiling with
    # online softmax (flash-style second grid axis marked "arbitrary").
    return pl.pallas_call(
        kernel,
        out_shape=jax.ShapeDtypeStruct((B, N, C), qkv.dtype),
        grid=(B,),
        in_specs=[
            pl.BlockSpec((1, N, threeC), lambda b: (b, 0, 0)),
            pl.BlockSpec((H, Kh, hd), lambda b: (0, 0, 0)),
            pl.BlockSpec((W, Kw, hd), lambda b: (0, 0, 0)),
            pl.BlockSpec((Kh + Kw, N), lambda b: (0, 0)),
        ],
        out_specs=pl.BlockSpec((1, N, C), lambda b: (b, 0, 0)),
        compiler_params=pltpu.CompilerParams(dimension_semantics=("parallel",)),
    )(qkv, Rh, Rw, E)


# ----------------------------------------------------------------------------
# Glue (parameter handling, rel-pos index extraction)
# ----------------------------------------------------------------------------
def get_rel_pos_jax(q_size, k_size, rel_pos):
    max_rel_dist = int(2 * max(q_size, k_size) - 1)
    # TODO(synk): F.interpolate linear-resize branch (rel_pos length !=
    # 2*size-1) not implemented; shapes are chosen so it is never taken.
    assert rel_pos.shape[0] == max_rel_dist
    q_coords = jnp.arange(q_size)[:, None] * max(k_size / q_size, 1.0)
    k_coords = jnp.arange(k_size)[None, :] * max(q_size / k_size, 1.0)
    rel = q_coords - k_coords + (k_size - 1) * max(q_size / k_size, 1.0)
    return rel_pos[rel.astype(jnp.int32)]


def attention_forward(x, w_qkv, b_qkv, w_proj, b_proj, rel_pos_h, rel_pos_w,
                      num_heads):
    B, H, W, C = x.shape
    N = H * W
    hd = C // num_heads
    scale = hd ** (-0.5)

    # qkv projection; kernel consumes the native (3C, C) weight layout (no .T)
    qkv = linear_pallas(x.reshape(B * N, C), w_qkv, b_qkv)       # (B*N, 3C)
    qkv = qkv.reshape(B, N, 3 * C)

    Rh = get_rel_pos_jax(H, H, rel_pos_h)                        # (H, H, hd)
    Rw = get_rel_pos_jax(W, W, rel_pos_w)                        # (W, W, hd)

    # key-index expansion one-hots, built once and stacked -> (Kh+Kw, N)
    col = jnp.arange(N, dtype=jnp.int32)
    Eh = (col[None, :] // W == jnp.arange(H, dtype=jnp.int32)[:, None]
          ).astype(x.dtype)                                       # (H, N)
    Ew = (col[None, :] % W == jnp.arange(W, dtype=jnp.int32)[:, None]
          ).astype(x.dtype)                                       # (W, N)
    E = jnp.concatenate([Eh, Ew], axis=0)                         # (H+W, N)

    o = attention_pallas(qkv, Rh, Rw, E, num_heads=num_heads,
                         H=H, W=W, scale=scale)                   # (B, N, C)
    o = linear_pallas(o.reshape(B * N, C), w_proj, b_proj)        # (B*N, C)
    return o.reshape(B, H, W, C)


def reference_forward(x, w_qkv, b_qkv, w_proj, b_proj, rel_pos_h, rel_pos_w,
                      num_heads):
    """Pure-JAX reference mirroring the PyTorch module (for validation)."""
    B, H, W, C = x.shape
    N = H * W
    hd = C // num_heads
    scale = hd ** (-0.5)

    qkv = x.reshape(B, N, C) @ w_qkv.T + b_qkv
    qkv = qkv.reshape(B, N, 3, num_heads, hd).transpose(2, 0, 3, 1, 4)
    qkv = qkv.reshape(3, B * num_heads, N, hd)
    q, k, v = qkv[0], qkv[1], qkv[2]

    attn = (q * scale) @ jnp.swapaxes(k, -2, -1)                  # (B*nh, N, N)

    Rh = get_rel_pos_jax(H, H, rel_pos_h)
    Rw = get_rel_pos_jax(W, W, rel_pos_w)
    r_q = q.reshape(B * num_heads, H, W, hd)
    rel_h = jnp.einsum('bhwc,hkc->bhwk', r_q, Rh)
    rel_w = jnp.einsum('bhwc,wkc->bhwk', r_q, Rw)
    attn = (attn.reshape(B * num_heads, H, W, H, W)
            + rel_h[:, :, :, :, None]
            + rel_w[:, :, :, None, :]).reshape(B * num_heads, N, N)

    attn = jax.nn.softmax(attn, axis=-1)
    o = (attn @ v).reshape(B, num_heads, H, W, hd).transpose(0, 2, 3, 1, 4)
    o = o.reshape(B, H, W, C)
    return o @ w_proj.T + b_proj


# ----------------------------------------------------------------------------
if __name__ == "__main__":
    B, H, W = 2, 8, 8
    dim, num_heads = 32, 4
    head_dim = dim // num_heads

    key = jax.random.PRNGKey(0)
    ks = jax.random.split(key, 7)
    x = jax.random.normal(ks[0], (B, H, W, dim), jnp.float32)
    w_qkv = jax.random.normal(ks[1], (3 * dim, dim), jnp.float32) * 0.05
    b_qkv = jax.random.normal(ks[2], (3 * dim,), jnp.float32) * 0.05
    w_proj = jax.random.normal(ks[3], (dim, dim), jnp.float32) * 0.05
    b_proj = jax.random.normal(ks[4], (dim,), jnp.float32) * 0.05
    # use_rel_pos=True path; module zero-inits these, but use small random
    # values here to actually exercise the rel-pos math.
    rel_pos_h = jax.random.normal(ks[5], (2 * H - 1, head_dim), jnp.float32) * 0.05
    rel_pos_w = jax.random.normal(ks[6], (2 * W - 1, head_dim), jnp.float32) * 0.05

    out = attention_forward(x, w_qkv, b_qkv, w_proj, b_proj,
                            rel_pos_h, rel_pos_w, num_heads)
    out = jax.block_until_ready(out)

    ref = reference_forward(x, w_qkv, b_qkv, w_proj, b_proj,
                            rel_pos_h, rel_pos_w, num_heads)
    ref = jax.block_until_ready(ref)

    assert out.shape == (B, H, W, dim), out.shape
    assert jnp.allclose(out, ref, atol=2e-3, rtol=2e-3), \
        f"max abs diff = {jnp.max(jnp.abs(out - ref))}"
    print("KERNEL_OK")
</pallas_src>

<mosaic_0001>
module attributes {stable_mosaic.version = 11 : i64} {
  func.func @_linear_kernel(%arg0: i32, %arg1: i32, %arg2: i32, %arg3: memref<128x32xf32, #tpu.memory_space<vmem>>, %arg4: memref<96x32xf32, #tpu.memory_space<vmem>>, %arg5: memref<1x96xf32, #tpu.memory_space<vmem>>, %arg6: memref<128x96xf32, #tpu.memory_space<vmem>>, %arg7: memref<128x96xf32, #tpu.memory_space<vmem>>) attributes {dimension_semantics = [#tpu.dimension_semantics<parallel>, #tpu.dimension_semantics<parallel>, #tpu.dimension_semantics<arbitrary>], iteration_bounds = array<i64: 1, 1, 1>, scalar_prefetch = 0 : i64, scratch_operands = 1 : i64, tpu.core_type = #tpu.core_type<tc>, window_params = [{transform_indices = @transform_0, window_bounds = array<i64: 128, 32>}, {transform_indices = @transform_1, window_bounds = array<i64: 96, 32>}, {transform_indices = @transform_2, window_bounds = array<i64: 1, 96>}, {transform_indices = @transform_3, window_bounds = array<i64: 128, 96>}]} {
    %c0_i32 = arith.constant 0 : i32
    %0 = arith.cmpi eq, %arg2, %c0_i32 : i32
    %1 = arith.extui %0 : i1 to i32
    %c0_i32_0 = arith.constant 0 : i32
    %2 = arith.cmpi ne, %1, %c0_i32_0 : i32
    scf.if %2 {
      %cst_10 = arith.constant 0.000000e+00 : f32
      %12 = vector.broadcast %cst_10 : f32 to vector<128x96xf32>
      %c0_11 = arith.constant 0 : index
      %c0_12 = arith.constant 0 : index
      %13 = vector.load %arg7[%c0_11, %c0_12] : memref<128x96xf32, #tpu.memory_space<vmem>>, vector<128x96xf32>
      tpu.vector_store %arg7[%c0_11, %c0_12], %12 {strides = array<i32>} : memref<128x96xf32, #tpu.memory_space<vmem>>, vector<128x96xf32>,
    } else {
    }
    %c0 = arith.constant 0 : index
    %c0_1 = arith.constant 0 : index
    %3 = vector.load %arg7[%c0, %c0_1] : memref<128x96xf32, #tpu.memory_space<vmem>>, vector<128x96xf32>
    %c0_2 = arith.constant 0 : index
    %c0_3 = arith.constant 0 : index
    %4 = vector.load %arg3[%c0_2, %c0_3] : memref<128x32xf32, #tpu.memory_space<vmem>>, vector<128x32xf32>
    %c0_4 = arith.constant 0 : index
    %c0_5 = arith.constant 0 : index
    %5 = vector.load %arg4[%c0_4, %c0_5] : memref<96x32xf32, #tpu.memory_space<vmem>>, vector<96x32xf32>
    %cst = arith.constant dense<0.000000e+00> : vector<128x96xf32>
    %6 = tpu.matmul %4, %5, %cst {dimension_numbers = #tpu.dot_dimension_numbers<[1], [1], [0], [0], [0, 0, 1, 0], [], []>} : vector<128x32xf32>, vector<96x32xf32>, vector<128x96xf32> -> vector<128x96xf32>
    %7 = arith.addf %3, %6 : vector<128x96xf32>
    %c0_6 = arith.constant 0 : index
    %c0_7 = arith.constant 0 : index
    %8 = vector.load %arg7[%c0_6, %c0_7] : memref<128x96xf32, #tpu.memory_space<vmem>>, vector<128x96xf32>
    tpu.vector_store %arg7[%c0_6, %c0_7], %7 {strides = array<i32>} : memref<128x96xf32, #tpu.memory_space<vmem>>, vector<128x96xf32>,
    %c0_i32_8 = arith.constant 0 : i32
    %9 = arith.cmpi eq, %arg2, %c0_i32_8 : i32
    %10 = arith.extui %9 : i1 to i32
    %c0_i32_9 = arith.constant 0 : i32
    %11 = arith.cmpi ne, %10, %c0_i32_9 : i32
    scf.if %11 {
      %c0_10 = arith.constant 0 : index
      %c0_11 = arith.constant 0 : index
      %12 = vector.load %arg7[%c0_10, %c0_11] : memref<128x96xf32, #tpu.memory_space<vmem>>, vector<128x96xf32>
      %c0_12 = arith.constant 0 : index
      %c0_13 = arith.constant 0 : index
      %13 = vector.load %arg5[%c0_12, %c0_13] : memref<1x96xf32, #tpu.memory_space<vmem>>, vector<1x96xf32>
      %14 = vector.broadcast %13 : vector<1x96xf32> to vector<128x96xf32>
      %15 = arith.addf %12, %14 : vector<128x96xf32>
      %c0_14 = arith.constant 0 : index
      %c0_15 = arith.constant 0 : index
      %16 = vector.load %arg6[%c0_14, %c0_15] : memref<128x96xf32, #tpu.memory_space<vmem>>, vector<128x96xf32>
      tpu.vector_store %arg6[%c0_14, %c0_15], %15 {strides = array<i32>} : memref<128x96xf32, #tpu.memory_space<vmem>>, vector<128x96xf32>,
    } else {
    }
    return
  }
  func.func @transform_0(%arg0: i32, %arg1: i32, %arg2: i32) -> (i32, i32) {
    %c0_i32 = arith.constant 0 : i32
    return %arg0, %arg2 : i32, i32
  }
  func.func @transform_1(%arg0: i32, %arg1: i32, %arg2: i32) -> (i32, i32) {
    %c0_i32 = arith.constant 0 : i32
    return %arg1, %arg2 : i32, i32
  }
  func.func @transform_2(%arg0: i32, %arg1: i32, %arg2: i32) -> (i32, i32) {
    %c0_i32 = arith.constant 0 : i32
    %c0_i32_0 = arith.constant 0 : i32
    return %c0_i32, %arg1 : i32, i32
  }
  func.func @transform_3(%arg0: i32, %arg1: i32, %arg2: i32) -> (i32, i32) {
    %c0_i32 = arith.constant 0 : i32
    return %arg0, %arg1 : i32, i32
  }
}

</mosaic_0001>

<bundles_post_ra>
// kernel: tpu_custom_call.1
= control target key start
LH: loop header
LB: loop body
LE: loop exit
PB: predicated region body
PF: predicated region fallthrough
CT: control target
= control target key end

     0   :  { %vm79_vm0 = vcmask 261120   ;;  %vm18_vm1 = vcmask 785408   ;;  %v534_v2 = vmov 0.0   ;;  %s820_s1 = inlined_call_operand.vmem [shape: f32[96,32], index: 1, kind: input, shape index: {}]   ;;  %s821_s0 = inlined_call_operand.vmem [shape: f32[128,32], index: 0, kind: input, shape index: {}]   ;;  %s822_s2 = inlined_call_operand.vmem [shape: f32[1,96], index: 2, kind: input, shape index: {}]   ;;  %s823_s3 = inlined_call_operand.vmem [shape: f32[128,96], index: 3, kind: output, shape index: {}]  }
   0x1   :  { %v78_v0 = vld [vmem:[%s820_s1 + $0x58] sm:$0xff]  ;;  %v77_v1 = vld [vmem:[%s820_s1 + $0x50] sm:$0xff]  ;;  %20 = vst.msk [vmem:[#allocation2 + $0x8] sm:$0xff] %vm18_vm1, %v534_v2  ;;  %19 = vst.msk [vmem:[#allocation2] sm:$0xff] %vm18_vm1, %v534_v2 }
   0x2   :  { %21 = vst.msk [vmem:[#allocation2 + $0x10] sm:$0xff] %vm18_vm1, %v534_v2  ;;  %22 = vst.msk [vmem:[#allocation2 + $0x18] sm:$0xff] %vm18_vm1, %v534_v2  ;;  %461 = vmatprep.subr.msk.mxu0 %vm79_vm0, %v78_v0  ;;  %509 = vmatprep.subr.msk.mxu1 %vm79_vm0, %v78_v0  ;;  %v76_v3 = vld [vmem:[%s820_s1 + $0x48] sm:$0xff]  ;;  %v51_v4 = vld [vmem:[%s821_s0] sm:$0xff] }
   0x3   :  { %23 = vst.msk [vmem:[#allocation2 + $0x20] sm:$0xff] %vm18_vm1, %v534_v2  ;;  %24 = vst.msk [vmem:[#allocation2 + $0x28] sm:$0xff] %vm18_vm1, %v534_v2  ;;  %462 = vmatpush3.xpose.msk.msra.mxu0 %vm79_vm0, %v78_v0  ;;  %521 = vmatpush3.xpose.msk.msra.mxu1 %vm79_vm0, %v78_v0  ;;  %v59_v5 = vld [vmem:[%s821_s0 + $0x40] sm:$0xff]  ;;  %v74_v7 = vld [vmem:[%s820_s1 + $0x38] sm:$0xff] }
   0x4   :  { %25 = vst.msk [vmem:[#allocation2 + $0x30] sm:$0xff] %vm18_vm1, %v534_v2  ;;  %26 = vst.msk [vmem:[#allocation2 + $0x38] sm:$0xff] %vm18_vm1, %v534_v2  ;;  %463 = vmatprep.subr.msk.mxu0 %vm79_vm0, %v77_v1  ;;  %510 = vmatprep.subr.msk.mxu1 %vm79_vm0, %v77_v1  ;;  %v75_v6 = vld [vmem:[%s820_s1 + $0x40] sm:$0xff]  ;;  %v73_v8 = vld [vmem:[%s820_s1 + $0x30] sm:$0xff] }
   0x5   :  { %27 = vst.msk [vmem:[#allocation2 + $0x40] sm:$0xff] %vm18_vm1, %v534_v2  ;;  %28 = vst.msk [vmem:[#allocation2 + $0x48] sm:$0xff] %vm18_vm1, %v534_v2  ;;  %485 = vmatprep.mubr.msk.f32.mxu0 %vm79_vm0, %v51_v4  ;;  %497 = vmatprep.mubr.msk.f32.mxu1 %vm79_vm0, %v59_v5  ;;  %v72_v9 = vld [vmem:[%s820_s1 + $0x28] sm:$0xff]  ;;  %v71_v10 = vld [vmem:[%s820_s1 + $0x20] sm:$0xff] }
   0x6   :  { %29 = vst.msk [vmem:[#allocation2 + $0x50] sm:$0xff] %vm18_vm1, %v534_v2  ;;  %30 = vst.msk [vmem:[#allocation2 + $0x58] sm:$0xff] %vm18_vm1, %v534_v2  ;;  %v70_v11 = vld [vmem:[%s820_s1 + $0x18] sm:$0xff]  ;;  %v69_v12 = vld [vmem:[%s820_s1 + $0x10] sm:$0xff] }
   0x7   :  { %31 = vst.msk [vmem:[#allocation2 + $0x60] sm:$0xff] %vm18_vm1, %v534_v2  ;;  %32 = vst.msk [vmem:[#allocation2 + $0x68] sm:$0xff] %vm18_vm1, %v534_v2  ;;  %464 = vmatpush3.xpose.msk.msra.mxu0 %vm79_vm0, %v77_v1  ;;  %522 = vmatpush3.xpose.msk.msra.mxu1 %vm79_vm0, %v77_v1  ;;  %v68_v13 = vld [vmem:[%s820_s1 + $0x8] sm:$0xff]  ;;  %v67_v14 = vld [vmem:[%s820_s1] sm:$0xff] }
   0x8   :  { %33 = vst.msk [vmem:[#allocation2 + $0x70] sm:$0xff] %vm18_vm1, %v534_v2  ;;  %34 = vst.msk [vmem:[#allocation2 + $0x78] sm:$0xff] %vm18_vm1, %v534_v2  ;;  %465 = vmatprep.subr.msk.mxu0 %vm79_vm0, %v76_v3  ;;  %511 = vmatprep.subr.msk.mxu1 %vm79_vm0, %v76_v3  ;;  %v52_v15 = vld [vmem:[%s821_s0 + $0x8] sm:$0xff]  ;;  %v53_v17 = vld [vmem:[%s821_s0 + $0x10] sm:$0xff] }
   0x9   :  { %v60_v16 = vld [vmem:[%s821_s0 + $0x48] sm:$0xff]  ;;  %v61_v18 = vld [vmem:[%s821_s0 + $0x50] sm:$0xff]  ;;  %v54_v19 = vld [vmem:[%s821_s0 + $0x18] sm:$0xff] }
   0xa   :  { %v62_v20 = vld [vmem:[%s821_s0 + $0x58] sm:$0xff]  ;;  %v55_v21 = vld [vmem:[%s821_s0 + $0x20] sm:$0xff]  ;;  %v56_v23 = vld [vmem:[%s821_s0 + $0x28] sm:$0xff] }
   0xb   :  { %466 = vmatpush3.xpose.msk.msra.mxu0 %vm79_vm0, %v76_v3  ;;  %523 = vmatpush3.xpose.msk.msra.mxu1 %vm79_vm0, %v76_v3  ;;  %v63_v22 = vld [vmem:[%s821_s0 + $0x60] sm:$0xff]  ;;  %v64_v24 = vld [vmem:[%s821_s0 + $0x68] sm:$0xff]  ;;  %v57_v25 = vld [vmem:[%s821_s0 + $0x30] sm:$0xff] }
   0xc   :  { %467 = vmatprep.subr.msk.mxu0 %vm79_vm0, %v75_v6  ;;  %512 = vmatprep.subr.msk.mxu1 %vm79_vm0, %v75_v6  ;;  %v65_v26 = vld [vmem:[%s821_s0 + $0x70] sm:$0xff]  ;;  %v58_v27 = vld [vmem:[%s821_s0 + $0x38] sm:$0xff]  ;;  %v36_v29 = vld [vmem:[#allocation2 + $0x8] sm:$0xff] }
   0xd   :  { %v66_v28 = vld [vmem:[%s821_s0 + $0x78] sm:$0xff]  ;;  %v44_v30 = vld [vmem:[#allocation2 + $0x48] sm:$0xff]  ;;  %v35_v33 = vld [vmem:[#allocation2] sm:$0xff] }
   0xe   :  { %v43_v34 = vld [vmem:[#allocation2 + $0x40] sm:$0xff]  ;;  %v38_v39 = vld [vmem:[#allocation2 + $0x18] sm:$0xff]  ;;  %v37_v45 = vld [vmem:[#allocation2 + $0x10] sm:$0xff] }
   0xf   :  { %468 = vmatpush3.xpose.msk.msra.mxu0 %vm79_vm0, %v75_v6  ;;  %524 = vmatpush3.xpose.msk.msra.mxu1 %vm79_vm0, %v75_v6  ;;  %v46_v40 = vld [vmem:[#allocation2 + $0x58] sm:$0xff]  ;;  %v45_v46 = vld [vmem:[#allocation2 + $0x50] sm:$0xff]  ;;  %v40_v51 = vld [vmem:[#allocation2 + $0x28] sm:$0xff] }
  0x10   :  { %469 = vmatprep.subr.msk.mxu0 %vm79_vm0, %v74_v7  ;;  %513 = vmatprep.subr.msk.mxu1 %vm79_vm0, %v74_v7  ;;  %v48_v52 = vld [vmem:[#allocation2 + $0x68] sm:$0xff]  ;;  %v728_v55 = vld [vmem:[%s822_s2] ss:$0 sm:$0xff]  ;;  %v42_v62 = vld [vmem:[#allocation2 + $0x38] sm:$0xff] }
  0x11   :  { %v39_v58 = vld [vmem:[#allocation2 + $0x20] sm:$0xff]  ;;  %v50_v3 = vld [vmem:[#allocation2 + $0x78] sm:$0xff] }
  0x12   :  { %v47_v59 = vld [vmem:[#allocation2 + $0x60] sm:$0xff] }
  0x13   :  { %470 = vmatpush3.xpose.msk.msra.mxu0 %vm79_vm0, %v74_v7  ;;  %525 = vmatpush3.xpose.msk.msra.mxu1 %vm79_vm0, %v74_v7 }
  0x14   :  { %471 = vmatprep.subr.msk.mxu0 %vm79_vm0, %v73_v8  ;;  %514 = vmatprep.subr.msk.mxu1 %vm79_vm0, %v73_v8 }
  0x17   :  { %472 = vmatpush3.xpose.msk.msra.mxu0 %vm79_vm0, %v73_v8  ;;  %526 = vmatpush3.xpose.msk.msra.mxu1 %vm79_vm0, %v73_v8  ;;  %v41_v8 = vld [vmem:[#allocation2 + $0x30] sm:$0xff] }
  0x18   :  { %473 = vmatprep.subr.msk.mxu0 %vm79_vm0, %v72_v9  ;;  %515 = vmatprep.subr.msk.mxu1 %vm79_vm0, %v72_v9 }
  0x1b   :  { %474 = vmatpush3.xpose.msk.msra.mxu0 %vm79_vm0, %v72_v9  ;;  %527 = vmatpush3.xpose.msk.msra.mxu1 %vm79_vm0, %v72_v9 }
  0x1c   :  { %475 = vmatprep.subr.msk.mxu0 %vm79_vm0, %v71_v10  ;;  %516 = vmatprep.subr.msk.mxu1 %vm79_vm0, %v71_v10 }
  0x1f   :  { %476 = vmatpush3.xpose.msk.msra.mxu0 %vm79_vm0, %v71_v10  ;;  %528 = vmatpush3.xpose.msk.msra.mxu1 %vm79_vm0, %v71_v10 }
  0x20   :  { %477 = vmatprep.subr.msk.mxu0 %vm79_vm0, %v70_v11  ;;  %517 = vmatprep.subr.msk.mxu1 %vm79_vm0, %v70_v11 }
  0x23   :  { %478 = vmatpush3.xpose.msk.msra.mxu0 %vm79_vm0, %v70_v11  ;;  %529 = vmatpush3.xpose.msk.msra.mxu1 %vm79_vm0, %v70_v11 }
  0x24   :  { %479 = vmatprep.subr.msk.mxu0 %vm79_vm0, %v69_v12  ;;  %518 = vmatprep.subr.msk.mxu1 %vm79_vm0, %v69_v12 }
  0x27   :  { %480 = vmatpush3.xpose.msk.msra.mxu0 %vm79_vm0, %v69_v12  ;;  %530 = vmatpush3.xpose.msk.msra.mxu1 %vm79_vm0, %v69_v12 }
  0x28   :  { %481 = vmatprep.subr.msk.mxu0 %vm79_vm0, %v68_v13  ;;  %519 = vmatprep.subr.msk.mxu1 %vm79_vm0, %v68_v13 }
  0x2b   :  { %482 = vmatpush3.xpose.msk.msra.mxu0 %vm79_vm0, %v68_v13  ;;  %531 = vmatpush3.xpose.msk.msra.mxu1 %vm79_vm0, %v68_v13  ;;  %v49_v13 = vld [vmem:[#allocation2 + $0x70] sm:$0xff] }
  0x2c   :  { %483 = vmatprep.subr.msk.mxu0 %vm79_vm0, %v67_v14  ;;  %520 = vmatprep.subr.msk.mxu1 %vm79_vm0, %v67_v14 }
  0x2f   :  { %484 = vmatpush3.xpose.msk.msra.mxu0 %vm79_vm0, %v67_v14  ;;  %532 = vmatpush3.xpose.msk.msra.mxu1 %vm79_vm0, %v67_v14 }
  0x32   :  { %486 = vmatmul.mubr.msk.f32.vlgmr.msra.gmra.mxu0 %vm79_vm0, %v52_v15  ;;  %498 = vmatmul.mubr.msk.f32.vlgmr.msra.gmra.mxu1 %vm79_vm0, %v60_v16 }
  0x33   :  { %488 = vmatprep.mubr.msk.f32.mxu0 %vm79_vm0, %v53_v17  ;;  %500 = vmatprep.mubr.msk.f32.mxu1 %vm79_vm0, %v61_v18 }
  0x36   :  { %489 = vmatmul.mubr.msk.f32.gmra.mxu0 %vm79_vm0, %v54_v19  ;;  %501 = vmatmul.mubr.msk.f32.gmra.mxu1 %vm79_vm0, %v62_v20 }
  0x37   :  { %491 = vmatprep.mubr.msk.f32.mxu0 %vm79_vm0, %v55_v21  ;;  %503 = vmatprep.mubr.msk.f32.mxu1 %vm79_vm0, %v63_v22 }
  0x3a   :  { %492 = vmatmul.mubr.msk.f32.gmra.mxu0 %vm79_vm0, %v56_v23  ;;  %504 = vmatmul.mubr.msk.f32.gmra.mxu1 %vm79_vm0, %v64_v24 }
  0x3b   :  { %494 = vmatprep.mubr.msk.f32.mxu0 %vm79_vm0, %v57_v25  ;;  %506 = vmatprep.mubr.msk.f32.mxu1 %vm79_vm0, %v65_v26 }
  0x3e   :  { %495 = vmatmul.mubr.msk.f32.gmra.mxu0 %vm79_vm0, %v58_v27  ;;  %507 = vmatmul.mubr.msk.f32.gmra.mxu1 %vm79_vm0, %v66_v28 }
  0xf2   :  { %v487_v31 = vpop.f32.mrf.mxu0  ;;  %v499_v32 = vpop.f32.mrf.mxu1 }
  0xf3   :  { %v310_v35 = vadd.f32 %v487_v31, %v36_v29  ;;  %v318_v36 = vadd.f32 %v499_v32, %v44_v30 }
  0xf4   :  { %v230_v37 = vpop.f32.mrf.mxu0  ;;  %v270_v38 = vpop.f32.mrf.mxu1 }
  0xf5   :  { %327 = vst.msk [vmem:[#allocation2 + $0x8] sm:$0xff] %vm18_vm1, %v310_v35  ;;  %335 = vst.msk [vmem:[#allocation2 + $0x48] sm:$0xff] %vm18_vm1, %v318_v36  ;;  %v309_v41 = vadd.f32 %v230_v37, %v35_v33  ;;  %v317_v42 = vadd.f32 %v270_v38, %v43_v34 }
  0xf6   :  { %v490_v43 = vpop.f32.mrf.mxu0  ;;  %v502_v44 = vpop.f32.mrf.mxu1 }
  0xf7   :  { %326 = vst.msk [vmem:[#allocation2] sm:$0xff] %vm18_vm1, %v309_v41  ;;  %334 = vst.msk [vmem:[#allocation2 + $0x40] sm:$0xff] %vm18_vm1, %v317_v42  ;;  %v312_v47 = vadd.f32 %v490_v43, %v38_v39  ;;  %v320_v48 = vadd.f32 %v502_v44, %v46_v40 }
  0xf8   :  { %v240_v49 = vpop.f32.mrf.mxu0  ;;  %v280_v50 = vpop.f32.mrf.mxu1 }
  0xf9   :  { %329 = vst.msk [vmem:[#allocation2 + $0x18] sm:$0xff] %vm18_vm1, %v312_v47  ;;  %337 = vst.msk [vmem:[#allocation2 + $0x58] sm:$0xff] %vm18_vm1, %v320_v48  ;;  %v311_v53 = vadd.f32 %v240_v49, %v37_v45  ;;  %v319_v54 = vadd.f32 %v280_v50, %v45_v46 }
  0xfa   :  { %v493_v56 = vpop.f32.mrf.mxu0  ;;  %v505_v57 = vpop.f32.mrf.mxu1 }
  0xfb   :  { %328 = vst.msk [vmem:[#allocation2 + $0x10] sm:$0xff] %vm18_vm1, %v311_v53  ;;  %336 = vst.msk [vmem:[#allocation2 + $0x50] sm:$0xff] %vm18_vm1, %v319_v54  ;;  %v314_v60 = vadd.f32 %v493_v56, %v40_v51  ;;  %v322_v61 = vadd.f32 %v505_v57, %v48_v52 }
  0xfc   :  { %v346_v63 = vld [vmem:[#allocation2 + $0x8] sm:$0xff]  ;;  %v250_v1 = vpop.f32.mrf.mxu0  ;;  %v290_v2 = vpop.f32.mrf.mxu1 }
  0xfd   :  { %v354_v0 = vld [vmem:[#allocation2 + $0x48] sm:$0xff]  ;;  %v369_v4 = vadd.f32 %v728_v55, %v346_v63  ;;  %331 = vst.msk [vmem:[#allocation2 + $0x28] sm:$0xff] %vm18_vm1, %v314_v60  ;;  %339 = vst.msk [vmem:[#allocation2 + $0x68] sm:$0xff] %vm18_vm1, %v322_v61  ;;  %v313_v6 = vadd.f32 %v250_v1, %v39_v58  ;;  %v321_v7 = vadd.f32 %v290_v2, %v47_v59 }
  0xfe   :  { %v377_v5 = vadd.f32 %v728_v55, %v354_v0  ;;  %v345_v9 = vld [vmem:[#allocation2] sm:$0xff]  ;;  %v496_v11 = vpop.f32.mrf.mxu0  ;;  %v508_v12 = vpop.f32.mrf.mxu1 }
  0xff   :  { %v353_v10 = vld [vmem:[#allocation2 + $0x40] sm:$0xff]  ;;  %385 = vst.msk [vmem:[%s823_s3 + $0x8] sm:$0xff] %vm18_vm1, %v369_v4  ;;  %v368_v14 = vadd.f32 %v728_v55, %v345_v9  ;;  %330 = vst.msk [vmem:[#allocation2 + $0x20] sm:$0xff] %vm18_vm1, %v313_v6  ;;  %v316_v16 = vadd.f32 %v496_v11, %v42_v62  ;;  %v324_v17 = vadd.f32 %v508_v12, %v50_v3 }
 0x100   :  { %393 = vst.msk [vmem:[%s823_s3 + $0x48] sm:$0xff] %vm18_vm1, %v377_v5  ;;  %v376_v15 = vadd.f32 %v728_v55, %v353_v10  ;;  %338 = vst.msk [vmem:[#allocation2 + $0x60] sm:$0xff] %vm18_vm1, %v321_v7  ;;  %v348_v18 = vld [vmem:[#allocation2 + $0x18] sm:$0xff]  ;;  %v260_v20 = vpop.f32.mrf.mxu0  ;;  %v300_v21 = vpop.f32.mrf.mxu1 }
 0x101   :  { %v356_v19 = vld [vmem:[#allocation2 + $0x58] sm:$0xff]  ;;  %384 = vst.msk [vmem:[%s823_s3] sm:$0xff] %vm18_vm1, %v368_v14  ;;  %v371_v22 = vadd.f32 %v728_v55, %v348_v18  ;;  %333 = vst.msk [vmem:[#allocation2 + $0x38] sm:$0xff] %vm18_vm1, %v316_v16  ;;  %v315_v24 = vadd.f32 %v260_v20, %v41_v8  ;;  %v323_v25 = vadd.f32 %v300_v21, %v49_v13 }
 0x102   :  { %392 = vst.msk [vmem:[%s823_s3 + $0x40] sm:$0xff] %vm18_vm1, %v376_v15  ;;  %v379_v23 = vadd.f32 %v728_v55, %v356_v19  ;;  %341 = vst.msk [vmem:[#allocation2 + $0x78] sm:$0xff] %vm18_vm1, %v324_v17  ;;  %v347_v26 = vld [vmem:[#allocation2 + $0x10] sm:$0xff] }
 0x103   :  { %v355_v27 = vld [vmem:[#allocation2 + $0x50] sm:$0xff]  ;;  %387 = vst.msk [vmem:[%s823_s3 + $0x18] sm:$0xff] %vm18_vm1, %v371_v22  ;;  %v370_v28 = vadd.f32 %v728_v55, %v347_v26  ;;  %332 = vst.msk [vmem:[#allocation2 + $0x30] sm:$0xff] %vm18_vm1, %v315_v24 }
 0x104   :  { %395 = vst.msk [vmem:[%s823_s3 + $0x58] sm:$0xff] %vm18_vm1, %v379_v23  ;;  %v378_v29 = vadd.f32 %v728_v55, %v355_v27  ;;  %340 = vst.msk [vmem:[#allocation2 + $0x70] sm:$0xff] %vm18_vm1, %v323_v25  ;;  %v350_v30 = vld [vmem:[#allocation2 + $0x28] sm:$0xff] }
 0x105   :  { %v358_v31 = vld [vmem:[#allocation2 + $0x68] sm:$0xff]  ;;  %386 = vst.msk [vmem:[%s823_s3 + $0x10] sm:$0xff] %vm18_vm1, %v370_v28  ;;  %v373_v32 = vadd.f32 %v728_v55, %v350_v30 }
 0x106   :  { %394 = vst.msk [vmem:[%s823_s3 + $0x50] sm:$0xff] %vm18_vm1, %v378_v29  ;;  %v381_v33 = vadd.f32 %v728_v55, %v358_v31  ;;  %v349_v34 = vld [vmem:[#allocation2 + $0x20] sm:$0xff] }
 0x107   :  { %v357_v35 = vld [vmem:[#allocation2 + $0x60] sm:$0xff]  ;;  %389 = vst.msk [vmem:[%s823_s3 + $0x28] sm:$0xff] %vm18_vm1, %v373_v32  ;;  %v372_v36 = vadd.f32 %v728_v55, %v349_v34 }
 0x108   :  { %397 = vst.msk [vmem:[%s823_s3 + $0x68] sm:$0xff] %vm18_vm1, %v381_v33  ;;  %v380_v37 = vadd.f32 %v728_v55, %v357_v35  ;;  %v352_v38 = vld [vmem:[#allocation2 + $0x38] sm:$0xff] }
 0x109   :  { %v360_v39 = vld [vmem:[#allocation2 + $0x78] sm:$0xff]  ;;  %388 = vst.msk [vmem:[%s823_s3 + $0x20] sm:$0xff] %vm18_vm1, %v372_v36  ;;  %v375_v40 = vadd.f32 %v728_v55, %v352_v38 }
 0x10a   :  { %396 = vst.msk [vmem:[%s823_s3 + $0x60] sm:$0xff] %vm18_vm1, %v380_v37  ;;  %v383_v41 = vadd.f32 %v728_v55, %v360_v39  ;;  %v351_v42 = vld [vmem:[#allocation2 + $0x30] sm:$0xff] }
 0x10b   :  { %v359_v43 = vld [vmem:[#allocation2 + $0x70] sm:$0xff]  ;;  %391 = vst.msk [vmem:[%s823_s3 + $0x38] sm:$0xff] %vm18_vm1, %v375_v40  ;;  %v374_v44 = vadd.f32 %v728_v55, %v351_v42 }
 0x10c   :  { %399 = vst.msk [vmem:[%s823_s3 + $0x78] sm:$0xff] %vm18_vm1, %v383_v41  ;;  %v382_v45 = vadd.f32 %v728_v55, %v359_v43 }
 0x10d   :  { %390 = vst.msk [vmem:[%s823_s3 + $0x30] sm:$0xff] %vm18_vm1, %v374_v44 }
 0x10e   :  { %398 = vst.msk [vmem:[%s823_s3 + $0x70] sm:$0xff] %vm18_vm1, %v382_v45 }

</bundles_post_ra>
